<compile_context>
chip_gen: v5e
topology: v5e:2x2
jax: 0.10.0
libtpu: 0.0.40
codegen_flags: <defaults>
</compile_context>

<pallas_src>
import math

import jax
import jax.numpy as jnp
from jax.experimental import pallas as pl
from jax.experimental.pallas import tpu as pltpu


def _round_up(a, b):
    return -(-a // b) * b


def _make_wsl1_kernel(fold, D, TM, T_blocks, rows):
    """Kernel factory.

    x_ref, y_ref : (TM, DK) tiles, DK = fold * D lanes (lane-dense when fold>1).
    w_ref        : (TM, fold) per-(kernel-row, group) weights.
    out_ref      : (1, 1, DK) resident per-chunk accumulator (128-lane partials).
    """
    DK = fold * D

    def kernel(x_ref, y_ref, w_ref, out_ref):
        c = pl.program_id(0)
        i = pl.program_id(1)

        # Zero the resident accumulator at the first step of the reduction axis.
        @pl.when(i == 0)
        def _():
            out_ref[...] = jnp.zeros((1, 1, DK), jnp.float32)

        # Subtract in the input dtype (matches `(x - y).float()`), then promote.
        z = (x_ref[...] - y_ref[...]).astype(jnp.float32)
        az = jnp.abs(z)

        # Only |w| matters: (z*w)^2 = (|z||w|)^2 and |z*w| = |z||w|.
        aw_small = jnp.abs(w_ref[...].astype(jnp.float32))        # (TM, fold)
        if fold == 1:
            aw = aw_small                                          # lane-broadcast
        else:
            # Expand each row's `fold` group weights across their D lanes with a
            # tiny matmul against a 0/1 selection matrix: idle MXU, ~0 VALU cost.
            lane = jax.lax.broadcasted_iota(jnp.int32, (fold, DK), 1)
            grp = jax.lax.broadcasted_iota(jnp.int32, (fold, DK), 0)
            sel = ((lane >= grp * D) & (lane < (grp + 1) * D)).astype(jnp.float32)
            aw = jnp.dot(aw_small, sel, preferred_element_type=jnp.float32)

        a = az * aw                                                # |z * w|
        # Branch condition uses the UNWEIGHTED |z|, matching the reference.
        per_elem = jnp.where(az < 0.01, 0.5 * a * a, 0.01 * a - 5e-5)

        row_start = (c * T_blocks + i) * TM

        # Full tile: unmasked per-lane accumulation (sublane reduce only).
        @pl.when(row_start + TM <= rows)
        def _():
            out_ref[...] += jnp.sum(per_elem, axis=0, keepdims=True)[None]

        # Ragged tail tile (and fully out-of-range tiles when num_chunks > 1):
        # zero out-of-range rows with a select so garbage/NaN rows contribute 0.
        @pl.when(row_start + TM > rows)
        def _():
            ridx = jax.lax.broadcasted_iota(jnp.int32, per_elem.shape, 0) + row_start
            masked = jnp.where(ridx < rows, per_elem, 0.0)
            out_ref[...] += jnp.sum(masked, axis=0, keepdims=True)[None]

    return kernel


def weight_smooth_l1_loss(x, y, weight, size_average=True, *,
                          num_chunks=1, target_tile_elems=512 * 1024,
                          chunk_dimension_semantics=None):
    """x, y: (..., D); weight: x.shape[:-1]. Returns scalar float32 loss.

    num_chunks=1 is right for single-TensorCore chips (v5e/v6e).  On v7x use
    num_chunks=2 and chunk_dimension_semantics=pltpu.CORE_PARALLEL so each
    TensorCore streams half the rows into its own partial accumulator.
    """
    assert x.shape == y.shape
    assert weight.shape == x.shape[:-1]
    D = x.shape[-1]
    M = math.prod(x.shape[:-1])

    # ---- lane-dense folding: merge `fold` rows into one kernel row so the ----
    # ---- lane width DK = fold*D is a multiple of 128 (metadata-only).      ----
    fold = 1
    if D % 128 != 0:
        base = 128 // math.gcd(D, 128)       # smallest f with (f*D) % 128 == 0
        if M % base == 0 and base * D <= 2048:
            fold = base
    DK = fold * D
    rows = M // fold

    num_chunks = max(1, min(num_chunks, rows))

    # ---- tile sizing: ~target_tile_elems per x tile, capped so the double- ----
    # ---- buffered VMEM footprint (incl. lane-padded weight tile) is modest ----
    TM = max(8, min(8192, _round_up(max(1, target_tile_elems // DK), 8)))
    TM = min(TM, _round_up(-(-rows // num_chunks), 8))

    w_lanes = _round_up(fold, 128)           # weight tile is lane-padded in VMEM

    def vmem_footprint(tm):
        return (2 * tm * DK * (x.dtype.itemsize + y.dtype.itemsize)   # x, y
                + 2 * tm * w_lanes * weight.dtype.itemsize            # w (padded)
                + 2 * num_chunks * DK * 4)                            # accumulators

    while TM > 8 and vmem_footprint(TM) > (24 << 20):
        TM = max(8, _round_up(TM // 2, 8))

    T_blocks = -(-rows // (num_chunks * TM))          # row tiles per chunk
    last_block = max(0, -(-rows // TM) - 1)           # last in-range row block

    # ---- free reshapes (row-major metadata only; no pad, no HBM copies) ----
    x2 = x.reshape(rows, DK)
    y2 = y.reshape(rows, DK)
    w2 = weight.reshape(rows, fold)

    def row_map(c, i):
        # Clamp so over-provisioned tiles in the last chunk never DMA out of
        # bounds; their contribution is zeroed by the in-kernel row mask.
        return (jnp.minimum(c * T_blocks + i, last_block), 0)

    kernel = _make_wsl1_kernel(fold, D, TM, T_blocks, rows)

    if chunk_dimension_semantics is None:
        # NOTE: plain "parallel" does not shard across v7x's two TensorCores;
        # pass pltpu.CORE_PARALLEL explicitly there (with num_chunks=2).
        chunk_dimension_semantics = "arbitrary" if num_chunks == 1 else "parallel"

    bytes_accessed = (x2.size * x.dtype.itemsize + y2.size * y.dtype.itemsize
                      + w2.size * weight.dtype.itemsize + num_chunks * DK * 4)
    cost = pl.CostEstimate(flops=12 * rows * DK, transcendentals=0,
                           bytes_accessed=bytes_accessed)

    partials = pl.pallas_call(
        kernel,
        out_shape=jax.ShapeDtypeStruct((num_chunks, 1, DK), jnp.float32),
        grid_spec=pltpu.PrefetchScalarGridSpec(
            num_scalar_prefetch=0,
            grid=(num_chunks, T_blocks),
            in_specs=[
                pl.BlockSpec((TM, DK), row_map),
                pl.BlockSpec((TM, DK), row_map),
                pl.BlockSpec((TM, fold), row_map),
            ],
            out_specs=pl.BlockSpec((1, 1, DK), lambda c, i: (c, 0, 0)),
        ),
        compiler_params=pltpu.CompilerParams(
            dimension_semantics=(chunk_dimension_semantics, "arbitrary"),
            vmem_limit_bytes=int(min(max(vmem_footprint(TM) + (12 << 20),
                                         24 << 20), 48 << 20)),
        ),
        cost_estimate=cost,
    )(x2, y2, w2)

    # Single cross-lane/chunk reduce, once, in the wrapper.
    total = jnp.sum(partials)

    if size_average:
        return total / jnp.float32(M * D)   # mean over last dim, mean over rest
    else:
        return total / jnp.float32(D)       # mean over last dim, sum over rest


def _reference(x, y, weight, size_average=True):
    z = (x - y).astype(jnp.float32)
    mse_mask = (jnp.abs(z) < 0.01).astype(jnp.float32)
    l1_mask = (jnp.abs(z) >= 0.01).astype(jnp.float32)
    mse = mse_mask * z * weight[..., None]
    l1 = l1_mask * z * weight[..., None]
    total = jnp.mean(0.5 * mse ** 2 * mse_mask, axis=-1)
    total = total + jnp.mean(0.01 * (jnp.abs(l1) - 0.005) * l1_mask, axis=-1)
    return jnp.mean(total) if size_average else jnp.sum(total)


if __name__ == "__main__":
    key = jax.random.PRNGKey(0)

    # Config A: fold>1 path (D=32 -> fold=4, DK=128), ragged tail, size_average.
    k1, k2, k3, key = jax.random.split(key, 4)
    B, N, D = 2, 8, 32
    xa = jax.random.normal(k1, (B, N, D), dtype=jnp.float32) * 0.02
    ya = jax.random.normal(k2, (B, N, D), dtype=jnp.float32) * 0.02
    wa = jax.random.uniform(k3, (B, N), dtype=jnp.float32)
    out_a = jax.block_until_ready(weight_smooth_l1_loss(xa, ya, wa, True))
    ref_a = _reference(xa, ya, wa, True)
    assert jnp.allclose(out_a, ref_a, rtol=1e-5, atol=1e-7), (out_a, ref_a)

    # Config B: fold==1 path (D=160 not 128-aligned, M=15 odd), negative
    # weights, size_average=False.
    k1, k2, k3, key = jax.random.split(key, 4)
    xb = jax.random.normal(k1, (3, 5, 160), dtype=jnp.float32) * 0.02
    yb = jax.random.normal(k2, (3, 5, 160), dtype=jnp.float32) * 0.02
    wb = jax.random.uniform(k3, (3, 5), dtype=jnp.float32, minval=-1.0, maxval=1.0)
    out_b = jax.block_until_ready(weight_smooth_l1_loss(xb, yb, wb, False))
    ref_b = _reference(xb, yb, wb, False)
    assert jnp.allclose(out_b, ref_b, rtol=1e-5, atol=1e-7), (out_b, ref_b)

    print("KERNEL_OK")
</pallas_src>

<mosaic_0001>
module attributes {stable_mosaic.version = 11 : i64} {
  func.func @kernel(%arg0: i32, %arg1: i32, %arg2: memref<8x128xf32, #tpu.memory_space<vmem>>, %arg3: memref<8x128xf32, #tpu.memory_space<vmem>>, %arg4: memref<8x4xf32, #tpu.memory_space<vmem>>, %arg5: memref<1x1x128xf32, #tpu.memory_space<vmem>>) attributes {dimension_semantics = [#tpu.dimension_semantics<arbitrary>, #tpu.dimension_semantics<arbitrary>], iteration_bounds = array<i64: 1, 1>, scalar_prefetch = 0 : i64, scratch_operands = 0 : i64, tpu.core_type = #tpu.core_type<tc>, window_params = [{transform_indices = @transform_0, window_bounds = array<i64: 8, 128>}, {transform_indices = @transform_1, window_bounds = array<i64: 8, 128>}, {transform_indices = @transform_2, window_bounds = array<i64: 8, 4>}, {transform_indices = @transform_3, window_bounds = array<i64: 1, 1, 128>}]} {
    %c0_i32 = arith.constant 0 : i32
    %0 = arith.cmpi eq, %arg1, %c0_i32 : i32
    %1 = arith.extui %0 : i1 to i32
    %c0_i32_0 = arith.constant 0 : i32
    %2 = arith.cmpi ne, %1, %c0_i32_0 : i32
    scf.if %2 {
      %cst_17 = arith.constant 0.000000e+00 : f32
      %45 = vector.broadcast %cst_17 : f32 to vector<1x1x128xf32>
      %c0_18 = arith.constant 0 : index
      %c0_19 = arith.constant 0 : index
      %c0_20 = arith.constant 0 : index
      %46 = vector.load %arg5[%c0_18, %c0_19, %c0_20] : memref<1x1x128xf32, #tpu.memory_space<vmem>>, vector<1x1x128xf32>
      tpu.vector_store %arg5[%c0_18, %c0_19, %c0_20], %45 {strides = array<i32>} : memref<1x1x128xf32, #tpu.memory_space<vmem>>, vector<1x1x128xf32>,
    } else {
    }
    %c0 = arith.constant 0 : index
    %c0_1 = arith.constant 0 : index
    %3 = vector.load %arg2[%c0, %c0_1] : memref<8x128xf32, #tpu.memory_space<vmem>>, vector<8x128xf32>
    %c0_2 = arith.constant 0 : index
    %c0_3 = arith.constant 0 : index
    %4 = vector.load %arg3[%c0_2, %c0_3] : memref<8x128xf32, #tpu.memory_space<vmem>>, vector<8x128xf32>
    %5 = arith.subf %3, %4 : vector<8x128xf32>
    %6 = math.absf %5 : vector<8x128xf32>
    %c0_4 = arith.constant 0 : index
    %c0_5 = arith.constant 0 : index
    %7 = vector.load %arg4[%c0_4, %c0_5] : memref<8x4xf32, #tpu.memory_space<vmem>>, vector<8x4xf32>
    %8 = math.absf %7 : vector<8x4xf32>
    %9 = tpu.iota {dimensions = array<i32: 1>} : vector<4x128xi32>
    %10 = tpu.iota {dimensions = array<i32: 0>} : vector<4x128xi32>
    %c32_i32 = arith.constant 32 : i32
    %11 = vector.broadcast %c32_i32 : i32 to vector<4x128xi32>
    %12 = arith.muli %10, %11 : vector<4x128xi32>
    %13 = arith.cmpi sge, %9, %12 : vector<4x128xi32>
    %c1_i32 = arith.constant 1 : i32
    %14 = vector.broadcast %c1_i32 : i32 to vector<4x128xi32>
    %15 = arith.addi %10, %14 : vector<4x128xi32>
    %c32_i32_6 = arith.constant 32 : i32
    %16 = vector.broadcast %c32_i32_6 : i32 to vector<4x128xi32>
    %17 = arith.muli %15, %16 : vector<4x128xi32>
    %18 = arith.cmpi slt, %9, %17 : vector<4x128xi32>
    %19 = arith.andi %13, %18 : vector<4x128xi1>
    %20 = arith.extui %19 : vector<4x128xi1> to vector<4x128xi32>
    %21 = arith.sitofp %20 : vector<4x128xi32> to vector<4x128xf32>
    %cst = arith.constant dense<0.000000e+00> : vector<8x128xf32>
    %22 = tpu.matmul %8, %21, %cst {dimension_numbers = #tpu.dot_dimension_numbers<[1], [0], [0], [1], [0, 0, 1, 1], [], []>} : vector<8x4xf32>, vector<4x128xf32>, vector<8x128xf32> -> vector<8x128xf32>
    %23 = arith.mulf %6, %22 : vector<8x128xf32>
    %cst_7 = arith.constant 0.00999999977 : f32
    %24 = vector.broadcast %cst_7 : f32 to vector<8x128xf32>
    %25 = arith.cmpf olt, %6, %24 : vector<8x128xf32>
    %cst_8 = arith.constant 5.000000e-01 : f32
    %26 = vector.broadcast %cst_8 : f32 to vector<8x128xf32>
    %27 = arith.mulf %26, %23 : vector<8x128xf32>
    %28 = arith.mulf %27, %23 : vector<8x128xf32>
    %cst_9 = arith.constant 0.00999999977 : f32
    %29 = vector.broadcast %cst_9 : f32 to vector<8x128xf32>
    %30 = arith.mulf %29, %23 : vector<8x128xf32>
    %cst_10 = arith.constant 5.000000e-05 : f32
    %31 = vector.broadcast %cst_10 : f32 to vector<8x128xf32>
    %32 = arith.subf %30, %31 : vector<8x128xf32>
    %33 = arith.select %25, %28, %32 : vector<8x128xi1>, vector<8x128xf32>
    %c1_i32_11 = arith.constant 1 : i32
    %34 = arith.muli %arg0, %c1_i32_11 : i32
    %35 = arith.addi %34, %arg1 : i32
    %c8_i32 = arith.constant 8 : i32
    %36 = arith.muli %35, %c8_i32 : i32
    %c8_i32_12 = arith.constant 8 : i32
    %37 = arith.addi %36, %c8_i32_12 : i32
    %c4_i32 = arith.constant 4 : i32
    %38 = arith.cmpi sle, %37, %c4_i32 : i32
    %39 = arith.extui %38 : i1 to i32
    %c0_i32_13 = arith.constant 0 : i32
    %40 = arith.cmpi ne, %39, %c0_i32_13 : i32
    scf.if %40 {
      %c0_17 = arith.constant 0 : index
      %c0_18 = arith.constant 0 : index
      %c0_19 = arith.constant 0 : index
      %45 = vector.load %arg5[%c0_17, %c0_18, %c0_19] : memref<1x1x128xf32, #tpu.memory_space<vmem>>, vector<1x1x128xf32>
      %cst_20 = arith.constant dense<0.000000e+00> : vector<128xf32>
      %46 = vector.multi_reduction <add>, %33, %cst_20 [0] : vector<8x128xf32> to vector<128xf32>
      %47 = vector.shape_cast %46 : vector<128xf32> to vector<1x128xf32>
      %48 = vector.shape_cast %47 : vector<1x128xf32> to vector<1x1x128xf32>
      %49 = arith.addf %45, %48 : vector<1x1x128xf32>
      %c0_21 = arith.constant 0 : index
      %c0_22 = arith.constant 0 : index
      %c0_23 = arith.constant 0 : index
      %50 = vector.load %arg5[%c0_21, %c0_22, %c0_23] : memref<1x1x128xf32, #tpu.memory_space<vmem>>, vector<1x1x128xf32>
      tpu.vector_store %arg5[%c0_21, %c0_22, %c0_23], %49 {strides = array<i32>} : memref<1x1x128xf32, #tpu.memory_space<vmem>>, vector<1x1x128xf32>,
    } else {
    }
    %c8_i32_14 = arith.constant 8 : i32
    %41 = arith.addi %36, %c8_i32_14 : i32
    %c4_i32_15 = arith.constant 4 : i32
    %42 = arith.cmpi sgt, %41, %c4_i32_15 : i32
    %43 = arith.extui %42 : i1 to i32
    %c0_i32_16 = arith.constant 0 : i32
    %44 = arith.cmpi ne, %43, %c0_i32_16 : i32
    scf.if %44 {
      %45 = tpu.iota {dimensions = array<i32: 0>} : vector<8x128xi32>
      %46 = vector.broadcast %36 : i32 to vector<8x128xi32>
      %47 = arith.addi %45, %46 : vector<8x128xi32>
      %c4_i32_17 = arith.constant 4 : i32
      %48 = vector.broadcast %c4_i32_17 : i32 to vector<8x128xi32>
      %49 = arith.cmpi slt, %47, %48 : vector<8x128xi32>
      %cst_18 = arith.constant 0.000000e+00 : f32
      %50 = vector.broadcast %cst_18 : f32 to vector<8x128xf32>
      %51 = arith.select %49, %33, %50 : vector<8x128xi1>, vector<8x128xf32>
      %c0_19 = arith.constant 0 : index
      %c0_20 = arith.constant 0 : index
      %c0_21 = arith.constant 0 : index
      %52 = vector.load %arg5[%c0_19, %c0_20, %c0_21] : memref<1x1x128xf32, #tpu.memory_space<vmem>>, vector<1x1x128xf32>
      %cst_22 = arith.constant dense<0.000000e+00> : vector<128xf32>
      %53 = vector.multi_reduction <add>, %51, %cst_22 [0] : vector<8x128xf32> to vector<128xf32>
      %54 = vector.shape_cast %53 : vector<128xf32> to vector<1x128xf32>
      %55 = vector.shape_cast %54 : vector<1x128xf32> to vector<1x1x128xf32>
      %56 = arith.addf %52, %55 : vector<1x1x128xf32>
      %c0_23 = arith.constant 0 : index
      %c0_24 = arith.constant 0 : index
      %c0_25 = arith.constant 0 : index
      %57 = vector.load %arg5[%c0_23, %c0_24, %c0_25] : memref<1x1x128xf32, #tpu.memory_space<vmem>>, vector<1x1x128xf32>
      tpu.vector_store %arg5[%c0_23, %c0_24, %c0_25], %56 {strides = array<i32>} : memref<1x1x128xf32, #tpu.memory_space<vmem>>, vector<1x1x128xf32>,
    } else {
    }
    return
  }
  func.func @transform_0(%arg0: i32, %arg1: i32) -> (i32, i32) {
    %c1_i32 = arith.constant 1 : i32
    %0 = arith.muli %arg0, %c1_i32 : i32
    %1 = arith.addi %0, %arg1 : i32
    %c0_i32 = arith.constant 0 : i32
    %2 = arith.minsi %1, %c0_i32 : i32
    %c0_i32_0 = arith.constant 0 : i32
    %c0_i32_1 = arith.constant 0 : i32
    return %2, %c0_i32_0 : i32, i32
  }
  func.func @transform_1(%arg0: i32, %arg1: i32) -> (i32, i32) {
    %c1_i32 = arith.constant 1 : i32
    %0 = arith.muli %arg0, %c1_i32 : i32
    %1 = arith.addi %0, %arg1 : i32
    %c0_i32 = arith.constant 0 : i32
    %2 = arith.minsi %1, %c0_i32 : i32
    %c0_i32_0 = arith.constant 0 : i32
    %c0_i32_1 = arith.constant 0 : i32
    return %2, %c0_i32_0 : i32, i32
  }
  func.func @transform_2(%arg0: i32, %arg1: i32) -> (i32, i32) {
    %c1_i32 = arith.constant 1 : i32
    %0 = arith.muli %arg0, %c1_i32 : i32
    %1 = arith.addi %0, %arg1 : i32
    %c0_i32 = arith.constant 0 : i32
    %2 = arith.minsi %1, %c0_i32 : i32
    %c0_i32_0 = arith.constant 0 : i32
    %c0_i32_1 = arith.constant 0 : i32
    return %2, %c0_i32_0 : i32, i32
  }
  func.func @transform_3(%arg0: i32, %arg1: i32) -> (i32, i32, i32) {
    %c0_i32 = arith.constant 0 : i32
    %c0_i32_0 = arith.constant 0 : i32
    %c0_i32_1 = arith.constant 0 : i32
    return %arg0, %c0_i32, %c0_i32_0 : i32, i32, i32
  }
}

</mosaic_0001>

<bundles_post_ra>
// kernel: tpu_custom_call.1
= control target key start
LH: loop header
LB: loop body
LE: loop exit
PB: predicated region body
PF: predicated region fallthrough
CT: control target
= control target key end

     0   :  { %8 = vsyncpa [#allocation3], 0  ;;  %s380_s0 = inlined_call_operand.hbm [shape: f32[4,128], index: 0, kind: input, shape index: {}]   ;;  %s381_s1 = inlined_call_operand.hbm [shape: f32[4,128], index: 1, kind: input, shape index: {}]   ;;  %s382_s2 = inlined_call_operand.hbm [shape: f32[4,4], index: 2, kind: input, shape index: {}]   ;;  %s383_s3 = inlined_call_operand.hbm [shape: f32[1,1,128], index: 3, kind: output, shape index: {}]  }
   0x1   :  { %9 = vsyncpa [#allocation6], 0 }
   0x2   :  { %10 = vsyncpa [#allocation4], 0 }
   0x3   :  { %21 = vsyncadd [#allocation3], 64  ;;  %s26_s14 = sshll.u32 %s380_s0, 4  ;;  %s341_s15 = smov [#allocation2]   ;;  %s27_s14 = int_to_ptr.hbm [resolvable:$true] %s26_s14 }
   0x4   :  { %s28_s16 = sshll.u32 %s341_s15, 4  ;;  %s342_s17 = smov 64   ;;  %s29_s16 = int_to_ptr.vmem [resolvable:$true] %s28_s16 }
   0x5   :  { %s343_s18 = smov 4  }
   0x6   :  { %34 = dma.hbm_to_vmem [thread:$0]  %s27_s14, 64, %s29_s16, [#allocation3], %s342_s17, %s342_s17, %s343_s18  }
   0x7   :  { %45 = vsyncadd [#allocation6], 64  ;;  %s50_s21 = sshll.u32 %s381_s1, 4  ;;  %s344_s22 = smov [#allocation5]   ;;  %s51_s21 = int_to_ptr.hbm [resolvable:$true] %s50_s21 }
   0x8   :  { %s52_s23 = sshll.u32 %s344_s22, 4  ;;  %s53_s23 = int_to_ptr.vmem [resolvable:$true] %s52_s23 }
   0x9   :  { %58 = dma.hbm_to_vmem [thread:$0]  %s51_s21, 64, %s53_s23, [#allocation6], %s342_s17, %s342_s17, %s343_s18  }
   0xa   :  { %69 = vsyncadd [#allocation6], 64  ;;  %s74_s25 = sshll.u32 %s382_s2, 4  ;;  %s345_s26 = smov [#allocation7]   ;;  %s75_s25 = int_to_ptr.hbm [resolvable:$true] %s74_s25 }
   0xb   :  { %s76_s27 = sshll.u32 %s345_s26, 4  ;;  %s77_s27 = int_to_ptr.vmem [resolvable:$true] %s76_s27 }
   0xc   :  { %82 = dma.hbm_to_vmem [thread:$0]  %s75_s25, 64, %s77_s27, [#allocation6], %s342_s17, %s342_s17, %s343_s18  }
   0xd   :  { %335 = dma.done.wait [#allocation3], 128  }
   0xe   :  { %336 = vsyncadd [#allocation3], 4294967168 }
   0xf   :  { %337 = dma.done.wait [#allocation6], 256  }
  0x10   :  { %338 = vsyncadd [#allocation6], 4294967040  ;;  %v124_v0 = vlaneseq  ;;  %v346_v1 = vmov 0.0   ;;  %v122_v7 = vld [vmem:[#allocation7] sm:$0xff]  ;;  %vm140_vm2 = vcmask 1043456   ;;  %vm136_vm4 = vcmask 31744  }
  0x11   :  { %117 = vst [vmem:[#allocation8] sm:$0x1] %v346_v1  ;;  %v123_v8 = vand.u32 2147483647, %v122_v7  ;;  %v118_v10 = vld [vmem:[#allocation2] sm:$0xff]  ;;  %v119_v11 = vld [vmem:[#allocation5] sm:$0xff] }
  0x12   :  { %v125_v2 = vand.u32 127, %v124_v0  ;;  %v127_v3 = vshrl.u32 %v124_v0, 7  ;;  %v120_v12 = vsub.f32 %v118_v10, %v119_v11  ;;  %s347_s1 = smov [#allocation8]   ;;  %s211_s30 = sshll.u32 %s383_s3, 4  ;;  %s212_s30 = int_to_ptr.hbm [resolvable:$true] %s211_s30 }
  0x13   :  { %s209_s2 = sshll.u32 %s347_s1, 4  ;;  %s210_s2 = int_to_ptr.vmem [resolvable:$true] %s209_s2 }
  0x14   :  { %v128_v4 = vmul.u32 32, %v127_v3  ;;  %v130_v5 = vadd.s32 1, %v127_v3  ;;  %v121_v13 = vand.u32 2147483647, %v120_v12  ;;  %vm193_vm6 = vcmp.lt.s32.totalorder %v127_v3, 4 }
  0x16   :  { %vm129_vm0 = vcmp.ge.s32.totalorder %v125_v2, %v128_v4  ;;  %v131_v6 = vmul.u32 32, %v130_v5  ;;  %vm165_vm5 = vcmp.lt.f32.partialorder %v121_v13, 0.01 }
  0x18   :  { %vm132_vm1 = vcmp.lt.s32.totalorder %v125_v2, %v131_v6  ;;  %v195_v27 = vld [vmem:[#allocation8] sm:$0x1] }
  0x19   :  { %vm133_vm3 = vmand %vm129_vm0, %vm132_vm1 }
  0x1a   :  { %v228_v9 = vsel %vm133_vm3, 1.0, %v346_v1 }
  0x1b   :  { %229 = vmatpush.msk.msra.mxu0 %vm140_vm2, %v228_v9 }
  0x1c   :  { %230 = vmatmul.msk.f32.vlgmr.msra.gmra.mxu0 %vm136_vm4, %v123_v8 }
  0x99   :  { %v161_v14 = vpop.f32.mrf.mxu0 }
  0x9a   :  { %v164_v15 = vmul.f32 %v161_v14, %v121_v13 }
  0x9c   :  { %v166_v16 = vmul.f32 0.5, %v164_v15  ;;  %v168_v17 = vmul.f32 0.01, %v164_v15 }
  0x9e   :  { %v167_v18 = vmul.f32 %v166_v16, %v164_v15  ;;  %v231_v19 = vadd.f32 -5e-05, %v168_v17 }
  0xa0   :  { %v170_v20 = vsel %vm165_vm5, %v167_v18, %v231_v19 }
  0xa1   :  { %v194_v21 = vsel %vm193_vm6, %v170_v20, 0.0 }
  0xa2   :  { %v196_v22 = vrot.slane %v194_v21, 4 }
  0xa4   :  { %v197_v23 = vadd.f32 %v196_v22, %v194_v21 }
  0xa6   :  { %v198_v24 = vrot.slane %v197_v23, 2 }
  0xa8   :  { %v199_v25 = vadd.f32 %v198_v24, %v197_v23 }
  0xaa   :  { %v200_v26 = vrot.slane %v199_v25, 1 }
  0xac   :  { %v201_v28 = vadd.f32 %v200_v26, %v199_v25 }
  0xae   :  { %v202_v29 = vadd.f32 %v201_v28, %v195_v27 }
  0xb0   :  { %203 = vst [vmem:[#allocation8] sm:$0x1] %v202_v29 }
  0xb1   :  { %214 = dma.vmem_to_hbm [thread:$0]  %s210_s2, 16, %s212_s30, [#allocation4]  }
  0xb2   :  { %339 = dma.done.wait [#allocation4], 16  }
  0xb3   :  { %340 = vsyncadd [#allocation4], 4294967280 }
  0xb4   :  { %219 = vsyncpa [#allocation3], 1 }
  0xb5   :  { %220 = vsyncpa [#allocation6], 1 }
  0xb6   :  { %221 = vsyncpa [#allocation4], 1 }

</bundles_post_ra>
